<compile_context>
chip_gen: v7x
topology: tpu7x:2x2x1
jax: 0.10.0
libtpu: 0.0.40
codegen_flags: <defaults>
</compile_context>

<pallas_src>
import jax
import jax.numpy as jnp
from jax.experimental import pallas as pl
from jax.experimental.pallas import tpu as pltpu


def _linear_kernel(x_ref, w_ref, o_ref):
    """One output tile: o = x_tile @ wT_tile (full-K contraction, no scratch).

    x_ref : (tm, d_in)   activation tile
    w_ref : (d_in, tn)   weight tile, already in (in, out) layout
    o_ref : (tm, tn)     output tile
    """
    o_ref[...] = jnp.dot(
        x_ref[...], w_ref[...], preferred_element_type=jnp.float32
    ).astype(o_ref.dtype)


def _round_up(x, m):
    return ((x + m - 1) // m) * m


def trainable_a_forward(
    x,
    w,
    *,
    tm_cap=512,                       # multiple of 8 (sublane aligned)
    tn_cap=512,                       # multiple of 128 (lane aligned)
    vmem_budget_bytes=40 * 1024 * 1024,
):
    """y = x @ w.T (nn.Linear, bias=False); w in PyTorch (out, in) layout.

    x: (batch, states_dim), w: (states_dim, states_dim)
    """
    batch, d_in = x.shape
    d_out, d_in_w = w.shape
    assert d_in == d_in_w, "weight in_features must match x's last dim"

    # One-time transpose to (in, out): the in-kernel contraction is then a
    # standard (M,K)x(K,N) matmul (clean vmatmul, no hidden per-step XLU
    # transpose of the W tile).  W is tiny relative to streamed activations.
    w_t = jnp.transpose(w)

    itemsize = jnp.dtype(x.dtype).itemsize

    def footprint(tm_, tn_):
        # Conservative double-buffered VMEM footprint of one grid step.
        x_b = 2 * tm_ * d_in * itemsize
        w_b = 2 * d_in * tn_ * itemsize
        o_b = 2 * tm_ * tn_ * itemsize
        return x_b + w_b + o_b

    # ---------------- M tile ----------------
    if batch <= tm_cap:
        tm = batch                                   # full-extent: always legal
        if batch >= 256:
            # Enough work to split across 2 TensorCores (v7x): keep >=2
            # parallel M blocks instead of one batch-sized block.
            tm = _round_up(pl.cdiv(batch, 2), 8)
    else:
        tm = tm_cap                                  # ragged edge handled by cdiv grid

    # ---------------- N tile: keep W fully resident if it fits ----------------
    tn = d_out
    while footprint(tm, tn) > vmem_budget_bytes and tm > 64:
        tm = max(8, _round_up(tm // 2, 8))

    if footprint(tm, tn) > vmem_budget_bytes and d_out >= 128:
        # W too large for a single resident block: stream (d_in, tn) stripes.
        tn = max(128, min((tn_cap // 128) * 128, (d_out // 128) * 128))
        while footprint(tm, tn) > vmem_budget_bytes and tn > 128:
            tn = max(128, (tn // 2 // 128) * 128)
        while footprint(tm, tn) > vmem_budget_bytes and tm > 8:
            tm = max(8, _round_up(tm // 2, 8))
    # TODO(synk): for states_dim so large that even a (d_in, 128) stripe plus a
    # small x tile misses VMEM, add a K-reduction grid axis with an f32
    # accumulator (not needed for realistic states_dim).

    m_blocks = pl.cdiv(batch, tm)

    if tn == d_out:
        # ---- single resident W block; 1-D grid over M ----
        grid = (m_blocks,)
        in_specs = [
            pl.BlockSpec((tm, d_in), lambda i: (i, 0)),
            # Constant block index -> W is DMA'd once and reused across all
            # M blocks (Pallas skips re-fetch when the block index repeats).
            pl.BlockSpec((d_in, d_out), lambda i: (0, 0)),
        ]
        out_specs = pl.BlockSpec((tm, d_out), lambda i: (i, 0))
        dim_sem = ("parallel",)
    else:
        n_blocks = pl.cdiv(d_out, tn)
        # Choose loop ordering by which operand is cheaper to re-stream:
        #   M-outer/N-inner : W re-read once per M block  -> m_blocks * |W|
        #   N-outer/M-inner : x re-read once per N block  -> n_blocks * |x|
        w_traffic_m_outer = m_blocks * d_in * d_out
        x_traffic_n_outer = n_blocks * batch * d_in
        if x_traffic_n_outer <= w_traffic_m_outer:
            grid = (n_blocks, m_blocks)              # N outer, M inner
            in_specs = [
                pl.BlockSpec((tm, d_in), lambda j, i: (i, 0)),
                pl.BlockSpec((d_in, tn), lambda j, i: (0, j)),
            ]
            out_specs = pl.BlockSpec((tm, tn), lambda j, i: (i, j))
        else:
            grid = (m_blocks, n_blocks)              # M outer, N inner
            in_specs = [
                pl.BlockSpec((tm, d_in), lambda i, j: (i, 0)),
                pl.BlockSpec((d_in, tn), lambda i, j: (0, j)),
            ]
            out_specs = pl.BlockSpec((tm, tn), lambda i, j: (i, j))
        dim_sem = ("parallel", "parallel")

    vmem_limit = int(min(48 * 1024 * 1024,
                         max(32 * 1024 * 1024, footprint(tm, tn) + (4 << 20))))

    return pl.pallas_call(
        _linear_kernel,
        out_shape=jax.ShapeDtypeStruct((batch, d_out), x.dtype),
        grid_spec=pltpu.PrefetchScalarGridSpec(
            num_scalar_prefetch=0,
            grid=grid,
            in_specs=in_specs,
            out_specs=out_specs,
            scratch_shapes=[],
        ),
        compiler_params=pltpu.CompilerParams(
            dimension_semantics=dim_sem,
            vmem_limit_bytes=vmem_limit,
        ),
    )(x, w_t)


# TODO(synk): if this layer is applied per-timestep in a recurrence, fuse the
# time loop into a single pallas_call (grid over T, W as a constant-index
# resident block, lane-dense output) instead of one tiny call per step.
# TODO(synk): if the model tolerates it, feed x/w as bfloat16 (with
# preferred_element_type=jnp.float32) to halve HBM traffic on this
# memory-bound kernel.


if __name__ == "__main__":
    key = jax.random.PRNGKey(0)
    kx, kw, kx2, kw2, kx3, kw3 = jax.random.split(key, 6)

    # 1) Small shapes consistent with the module: states_dim=32, batch=8.
    d, b = 32, 8
    bound = 1.0 / (d ** 0.5)
    w = jax.random.uniform(kw, (d, d), dtype=jnp.float32, minval=-bound, maxval=bound)
    x = jax.random.normal(kx, (b, d), dtype=jnp.float32)
    y = trainable_a_forward(x, w)
    jax.block_until_ready(y)
    assert y.shape == (b, d)
    assert jnp.allclose(y, x @ w.T, atol=1e-5, rtol=1e-5)

    # 2) Ragged multi-M-block path: batch not a multiple of the 512 M tile,
    #    W resident across M blocks, cdiv grid + edge masking on M.
    d2, b2 = 256, 640
    bound2 = 1.0 / (d2 ** 0.5)
    w2 = jax.random.uniform(kw2, (d2, d2), dtype=jnp.float32, minval=-bound2, maxval=bound2)
    x2 = jax.random.normal(kx2, (b2, d2), dtype=jnp.float32)
    y2 = trainable_a_forward(x2, w2)
    jax.block_until_ready(y2)
    assert y2.shape == (b2, d2)
    assert jnp.allclose(y2, x2 @ w2.T, atol=1e-3, rtol=1e-3)

    # 3) Force the W-stripe streaming fallback (tiny VMEM budget) to validate
    #    the tiled-N path and its traffic-aware loop ordering.
    d3, b3 = 384, 256
    bound3 = 1.0 / (d3 ** 0.5)
    w3 = jax.random.uniform(kw3, (d3, d3), dtype=jnp.float32, minval=-bound3, maxval=bound3)
    x3 = jax.random.normal(kx3, (b3, d3), dtype=jnp.float32)
    y3 = trainable_a_forward(x3, w3, vmem_budget_bytes=1 * 1024 * 1024)
    jax.block_until_ready(y3)
    assert y3.shape == (b3, d3)
    assert jnp.allclose(y3, x3 @ w3.T, atol=1e-3, rtol=1e-3)

    print("KERNEL_OK")
</pallas_src>

<mosaic_0001>
module attributes {stable_mosaic.version = 11 : i64} {
  func.func @_linear_kernel(%arg0: i32, %arg1: memref<8x32xf32, #tpu.memory_space<vmem>>, %arg2: memref<32x32xf32, #tpu.memory_space<vmem>>, %arg3: memref<8x32xf32, #tpu.memory_space<vmem>>) attributes {dimension_semantics = [#tpu.dimension_semantics<parallel>], iteration_bounds = array<i64: 1>, scalar_prefetch = 0 : i64, scratch_operands = 0 : i64, tpu.core_type = #tpu.core_type<tc>, window_params = [{transform_indices = @transform_0, window_bounds = array<i64: 8, 32>}, {pipeline_mode = #tpu.pipeline_mode<synchronous>, transform_indices = @transform_1, window_bounds = array<i64: 32, 32>}, {transform_indices = @transform_2, window_bounds = array<i64: 8, 32>}]} {
    %c0 = arith.constant 0 : index
    %c0_0 = arith.constant 0 : index
    %0 = vector.load %arg1[%c0, %c0_0] : memref<8x32xf32, #tpu.memory_space<vmem>>, vector<8x32xf32>
    %c0_1 = arith.constant 0 : index
    %c0_2 = arith.constant 0 : index
    %1 = vector.load %arg2[%c0_1, %c0_2] : memref<32x32xf32, #tpu.memory_space<vmem>>, vector<32x32xf32>
    %cst = arith.constant dense<0.000000e+00> : vector<8x32xf32>
    %2 = tpu.matmul %0, %1, %cst {dimension_numbers = #tpu.dot_dimension_numbers<[1], [0], [0], [1], [0, 0, 1, 1], [], []>} : vector<8x32xf32>, vector<32x32xf32>, vector<8x32xf32> -> vector<8x32xf32>
    %c0_3 = arith.constant 0 : index
    %c0_4 = arith.constant 0 : index
    %3 = vector.load %arg3[%c0_3, %c0_4] : memref<8x32xf32, #tpu.memory_space<vmem>>, vector<8x32xf32>
    tpu.vector_store %arg3[%c0_3, %c0_4], %2 {strides = array<i32>} : memref<8x32xf32, #tpu.memory_space<vmem>>, vector<8x32xf32>,
    return
  }
  func.func @transform_0(%arg0: i32) -> (i32, i32) {
    %c0_i32 = arith.constant 0 : i32
    %c0_i32_0 = arith.constant 0 : i32
    return %arg0, %c0_i32 : i32, i32
  }
  func.func @transform_1(%arg0: i32) -> (i32, i32) {
    %c0_i32 = arith.constant 0 : i32
    %c0_i32_0 = arith.constant 0 : i32
    %c0_i32_1 = arith.constant 0 : i32
    return %c0_i32, %c0_i32_0 : i32, i32
  }
  func.func @transform_2(%arg0: i32) -> (i32, i32) {
    %c0_i32 = arith.constant 0 : i32
    %c0_i32_0 = arith.constant 0 : i32
    return %arg0, %c0_i32 : i32, i32
  }
}

</mosaic_0001>

<bundles_post_ra>
// kernel: tpu_custom_call.1
= control target key start
LH: loop header
LB: loop body
LE: loop exit
PB: predicated region body
PF: predicated region fallthrough
CT: control target
= control target key end

     0   :  { %7 = vsyncpa [#allocation3], 0  ;;  %s303_s0 = inlined_call_operand.hbm [shape: f32[8,32], index: 0, kind: input, shape index: {}]   ;;  %s304_s1 = inlined_call_operand.hbm [shape: f32[32,32], index: 1, kind: input, shape index: {}]   ;;  %s305_s2 = inlined_call_operand.hbm [shape: f32[8,32], index: 2, kind: output, shape index: {}]  }
   0x1   :  { %8 = vsyncpa [#allocation6], 0 }
   0x2   :  { %9 = vsyncpa [#allocation4], 0  ;;  %s237_s9 = smov [#allocation2]   ;;  %s238_s11 = smov [#allocation5]  }
   0x3   :  { %s16_s10 = sshll.u32 %s237_s9, 4  ;;  %s25_s12 = sshll.u32 %s238_s11, 4  ;;  %s17_s10 = int_to_ptr.vmem [resolvable:$true] %s16_s10  ;;  %s260_s12 = int_to_ptr.vmem [resolvable:$true] %s25_s12 }
   0x4   :  { %s165_s15 = scalar_lea.hbm %s303_s0, 128 }
   0x5   :  { %p166_p0 = scmp.ne.s32.totalorder %s303_s0, %s165_s15  ;;  %p169_p1 = scmp.lt.u32.totalorder %s165_s15, %s303_s0 }
   0x7   :  { %p171_p2 = pnand %p169_p1, %p166_p0 }
   0x9   :  { %174 = shalt.err (!%p171_p2)
}
   0xa   :  { %s175_s20 = scalar_lea.vmem %s17_s10, 128  ;;  %p180_p4 = scmp.lt.s32.totalorder %s17_s10, %s17_s10 }
   0xb   :  { %p176_p3 = scmp.ne.s32.totalorder %s17_s10, %s175_s20  ;;  %p181_p5 = scmp.lt.s32.totalorder %s175_s20, %s175_s20 }
   0xd   :  { %p182_p6 = por %p181_p5, %p180_p4 }
   0xf   :  { %p183_p7 = pnand %p182_p6, %p176_p3 }
  0x11   :  { %186 = shalt.err (!%p183_p7)
}
  0x12   :  { %19 = dma.hbm_to_vmem [thread:$0]  %s303_s0, 128, %s17_s10, [#allocation3]  }
  0x13   :  { %s187_s25 = scalar_lea.hbm %s304_s1, 512 }
  0x14   :  { %p188_p8 = scmp.ne.s32.totalorder %s304_s1, %s187_s25  ;;  %p191_p9 = scmp.lt.u32.totalorder %s187_s25, %s304_s1 }
  0x16   :  { %p193_p10 = pnand %p191_p9, %p188_p8 }
  0x18   :  { %196 = shalt.err (!%p193_p10)
}
  0x19   :  { %s197_s30 = scalar_lea.vmem %s260_s12, 512  ;;  %p202_p12 = scmp.lt.s32.totalorder %s260_s12, %s260_s12 }
  0x1a   :  { %p198_p11 = scmp.ne.s32.totalorder %s260_s12, %s197_s30  ;;  %p203_p13 = scmp.lt.s32.totalorder %s197_s30, %s197_s30 }
  0x1c   :  { %p204_p0 = por %p203_p13, %p202_p12 }
  0x1e   :  { %p205_p1 = pnand %p204_p0, %p198_p11 }
  0x20   :  { %208 = shalt.err (!%p205_p1)
}
  0x21   :  { %s239_s0 = smov 128   ;;  %s240_s3 = smov 8  }
  0x22   :  { %31 = dma.hbm_to_vmem [thread:$0]  %s304_s1, 512, %s260_s12, [#allocation6], %s239_s0, %s239_s0, %s240_s3  }
  0x23   :  { %231 = dma.done.wait [#allocation3], 128  }
  0x24   :  { %232 = vsyncadd [#allocation3], 4294967168 }
  0x25   :  { %233 = dma.done.wait [#allocation6], 512  }
  0x26   :  { %234 = vsyncadd [#allocation6], 4294966784  ;;  %v241_v0 = vmov 0.0|0.0   ;;  %vm242_vm0 = vmmov 0   ;;  %v243_v1 = vmov 0.0   ;;  %v39_v2 = vld [vmem:[#allocation5] sm:$0xff] }
  0x27   :  { %151 = vmatprep.subr.bf16.mxu0 %v241_v0  ;;  %148 = vmatprep.mubr.msk.f32.mxu0 %vm242_vm0, %v243_v1  ;;  %v40_v3 = vld [vmem:[#allocation5 + $0x8] sm:$0xff]  ;;  %v41_v4 = vld [vmem:[#allocation5 + $0x10] sm:$0xff]  ;;  %v42_v6 = vld [vmem:[#allocation5 + $0x18] sm:$0xff]  ;;  %vm43_vm1 = vcmask 261120   ;;  %s244_s1 = smov [#allocation7]  }
  0x28   :  { %v152_v5 = vpack.c.bf16 %v40_v3, %v39_v2  ;;  %v155_v7 = vpack.c.bf16 %v42_v6, %v41_v4  ;;  %v38_v8 = vld [vmem:[#allocation2] sm:$0xff]  ;;  %s124_s6 = sshll.u32 %s244_s1, 4  ;;  %s125_s6 = int_to_ptr.vmem [resolvable:$true] %s124_s6 }
  0x29   :  { %s209_s7 = scalar_lea.vmem %s125_s6, 128  ;;  %p214_p3 = scmp.lt.s32.totalorder %s125_s6, %s125_s6 }
  0x2a   :  { %153 = vmatpush3.bf16.msra.mxu0 %v152_v5  ;;  %p210_p2 = scmp.ne.s32.totalorder %s125_s6, %s209_s7  ;;  %p215_p4 = scmp.lt.s32.totalorder %s209_s7, %s209_s7 }
  0x2b   :  { %154 = vmatprep.subr.bf16.mxu0 %v241_v0 }
  0x2c   :  { %p216_p5 = por %p215_p4, %p214_p3 }
  0x2e   :  { %156 = vmatpush3.bf16.msra.mxu0 %v155_v7  ;;  %p217_p6 = pnand %p216_p5, %p210_p2 }
  0x31   :  { %149 = vmatmul.mubr.msk.f32.vlgmr.msra.gmra.mrb[0].mxu0 %vm43_vm1, %v38_v8 }
 0x104   :  { %v113_v9 = vpop.f32.mrb[0].mxu0 }
 0x105   :  { %117 = vst.msk [vmem:[#allocation7] sm:$0xff] %vm43_vm1, %v113_v9  ;;  %v150_v10 = vpop.f32.mrb[1].mxu0 }
 0x106   :  { %220 = shalt.err (!%p217_p6)
}
 0x107   :  { %s221_s10 = scalar_lea.hbm %s305_s2, 128 }
 0x108   :  { %p222_p7 = scmp.ne.s32.totalorder %s305_s2, %s221_s10  ;;  %p225_p8 = scmp.lt.u32.totalorder %s221_s10, %s305_s2 }
 0x10a   :  { %p227_p9 = pnand %p225_p8, %p222_p7 }
 0x10c   :  { %230 = shalt.err (!%p227_p9)
}
 0x10d   :  { %127 = dma.vmem_to_hbm [thread:$0]  %s125_s6, 128, %s305_s2, [#allocation4]  }
 0x10e   :  { %235 = dma.done.wait [#allocation4], 128  }
 0x10f   :  { %236 = vsyncadd [#allocation4], 4294967168 }
 0x110   :  { %131 = vsyncpa [#allocation3], 1 }
 0x111   :  { %132 = vsyncpa [#allocation6], 1 }
 0x112   :  { %133 = vsyncpa [#allocation4], 1 }

</bundles_post_ra>
